<compile_context>
chip_gen: v7x
topology: tpu7x:2x2x1
jax: 0.10.0
libtpu: 0.0.40
codegen_flags: <defaults>
</compile_context>

<pallas_src>
import functools

import jax
import jax.numpy as jnp
from jax.experimental import pallas as pl
from jax.experimental.pallas import tpu as pltpu


# ---------------------------------------------------------------------------
# helpers
# ---------------------------------------------------------------------------
def _round_up(v, m):
    return ((v + m - 1) // m) * m


def _pick_tile(dim, unit, cap):
    """Largest multiple of `unit` that divides `dim` and is <= cap; else full dim."""
    if dim % unit != 0:
        return dim
    cap = max(cap, unit)
    best = unit
    t = unit
    while t <= min(dim, cap):
        if dim % t == 0:
            best = t
        t += unit
    return best


# ---------------------------------------------------------------------------
# Pass 1: streaming spatial-sum over a (B*C, HW) view
# ---------------------------------------------------------------------------
def _pool_kernel(x_ref, sum_ref, acc_ref, *, tile_hw, acc_in_vregs):
    # x_ref: (tile_r, tile_hw)   sum_ref: (tile_r, 1)   acc_ref: (tile_r, 128) f32
    j = pl.program_id(1)

    @pl.when(j == 0)
    def _():
        acc_ref[...] = jnp.zeros_like(acc_ref)

    n_chunks = tile_hw // 128
    if acc_in_vregs:
        # Accumulator lives in vregs within the step: one VMEM store per step,
        # chunk loads come straight from the ref (no whole-tile value).
        acc = acc_ref[...]
        for k in range(n_chunks):
            acc = acc + x_ref[:, k * 128:(k + 1) * 128].astype(jnp.float32)
        acc_ref[...] = acc
    else:
        # Large tile_r: keep the accumulator in VMEM to bound vreg pressure.
        for k in range(n_chunks):
            acc_ref[...] += x_ref[:, k * 128:(k + 1) * 128].astype(jnp.float32)

    @pl.when(j == pl.num_programs(1) - 1)
    def _():
        # Single cross-lane (XLU) reduce per rows-block, once per row sweep.
        sum_ref[...] = jnp.sum(acc_ref[...], axis=-1, keepdims=True)


# ---------------------------------------------------------------------------
# Gate: batched FC1 / ReLU / FC2 / sigmoid in one tiny single-block kernel
# ---------------------------------------------------------------------------
def _gate_kernel(pooled_ref, w1t_ref, b1_ref, w2t_ref, b2_ref, gate_ref, *, inv_hw):
    # pooled_ref: (B, C) raw sums; w1t: (C, hidden); b1: (1, hidden)
    # w2t: (hidden, C); b2: (1, C); gate_ref: (B, C)
    pooled = pooled_ref[...] * inv_hw                                        # mean
    h = jnp.dot(pooled, w1t_ref[...],
                preferred_element_type=jnp.float32) + b1_ref[...]            # (B, hidden)
    h = jnp.maximum(h, 0.0)
    s = jnp.dot(h, w2t_ref[...],
                preferred_element_type=jnp.float32) + b2_ref[...]            # (B, C)
    gate_ref[...] = jax.nn.sigmoid(s).astype(gate_ref.dtype)


# ---------------------------------------------------------------------------
# Pass 2: lane-dense broadcast of the (already output-dtype) gate column
# ---------------------------------------------------------------------------
def _broadcast_kernel(gate_ref, o_ref):
    # gate_ref: (tile_r, 1) already in o dtype   o_ref: (tile_r, tile_hw)
    # NOTE: the module returns the expanded gate only; if it multiplied by x,
    # the x tile would be an extra input and fused here as o = x * gate.
    o_ref[...] = jnp.broadcast_to(gate_ref[...], o_ref.shape)


# ---------------------------------------------------------------------------
# Wrapper
# ---------------------------------------------------------------------------
def squeeze_excite(x, w1, b1, w2, b2, *,
                   tile_hw=4096, tile_rows=128,
                   bcast_tile_hw=2048, bcast_tile_rows=512):
    """x: (B, C, H, W); w1: (hidden, C); b1: (hidden,); w2: (C, hidden); b2: (C,)."""
    B, C, H, W = x.shape
    hidden = w1.shape[0]
    HW = H * W
    rows = B * C

    # Pad to the (8, 128) fast path instead of full-extent fallback blocks.
    rows_p = _round_up(rows, 8)
    HW_p = _round_up(HW, 128)
    x2 = x.reshape(rows, HW)
    if rows_p != rows or HW_p != HW:
        # TODO(synk): a remainder-block path would avoid this extra HBM copy for
        # very large unaligned inputs; zero padding keeps every shape lane-dense.
        x2 = jnp.pad(x2, ((0, rows_p - rows), (0, HW_p - HW)))

    # --- pass 1: row sums over HW -------------------------------------------------
    thw = _pick_tile(HW_p, 128, tile_hw)
    tr = _pick_tile(rows_p, 8, tile_rows)
    sums = pl.pallas_call(
        functools.partial(_pool_kernel, tile_hw=thw, acc_in_vregs=(tr <= 128)),
        out_shape=jax.ShapeDtypeStruct((rows_p, 1), jnp.float32),
        grid_spec=pltpu.PrefetchScalarGridSpec(
            num_scalar_prefetch=0,
            grid=(rows_p // tr, HW_p // thw),          # HW (reduction) axis last
            in_specs=[pl.BlockSpec((tr, thw), lambda r, j: (r, j))],
            out_specs=pl.BlockSpec((tr, 1), lambda r, j: (r, 0)),
            scratch_shapes=[pltpu.VMEM((tr, 128), jnp.float32)],
        ),
        compiler_params=pltpu.CompilerParams(
            # HW axis MUST stay "arbitrary": the (tr, 128) scratch accumulator
            # relies on it being iterated in-order, innermost.
            dimension_semantics=("parallel", "arbitrary"),
            vmem_limit_bytes=48 * 1024 * 1024,
        ),
    )(x2)

    # --- gate: one batched GEMM for all B, outside the streaming pipeline ----------
    pooled = sums[:rows, 0].reshape(B, C)
    gate = pl.pallas_call(
        functools.partial(_gate_kernel, inv_hw=1.0 / HW),
        out_shape=jax.ShapeDtypeStruct((B, C), jnp.float32),
    )(pooled, w1.T, b1.reshape(1, hidden), w2.T, b2.reshape(1, C))

    # --- pass 2: broadcast gate over HW (rows = B*C folded onto sublanes) ----------
    gate_col = gate.astype(x.dtype).reshape(rows, 1)   # cast once, before broadcast
    if rows_p != rows:
        gate_col = jnp.pad(gate_col, ((0, rows_p - rows), (0, 0)))

    tr2 = _pick_tile(rows_p, 8, bcast_tile_rows)
    thw2 = _pick_tile(HW_p, 128, bcast_tile_hw)
    out2 = pl.pallas_call(
        _broadcast_kernel,
        out_shape=jax.ShapeDtypeStruct((rows_p, HW_p), x.dtype),
        grid_spec=pltpu.PrefetchScalarGridSpec(
            num_scalar_prefetch=0,
            grid=(rows_p // tr2, HW_p // thw2),
            in_specs=[pl.BlockSpec((tr2, 1), lambda r, j: (r, 0))],
            out_specs=pl.BlockSpec((tr2, thw2), lambda r, j: (r, j)),
        ),
        compiler_params=pltpu.CompilerParams(
            dimension_semantics=("parallel", "parallel"),
            vmem_limit_bytes=48 * 1024 * 1024,
        ),
    )(gate_col)

    return out2[:rows, :HW].reshape(B, C, H, W)


# ---------------------------------------------------------------------------
# Pure-JAX reference (matches the PyTorch module forward)
# ---------------------------------------------------------------------------
def reference(x, w1, b1, w2, b2):
    pooled = jnp.mean(x, axis=(2, 3))
    h = jnp.maximum(pooled @ w1.T + b1, 0.0)
    s = jax.nn.sigmoid(h @ w2.T + b2)
    return jnp.broadcast_to(s[:, :, None, None], x.shape)


if __name__ == "__main__":
    key = jax.random.PRNGKey(0)

    # Config 1: in_ch = out_ch = 4 (expand_as requires out_ch == in_ch), se_ratio = 0.5
    B, C, H, W = 2, 4, 16, 16
    hidden = max(1, int(C * 0.5))
    kx, k1, k2, k3, k4, key = jax.random.split(key, 6)
    x = jax.random.normal(kx, (B, C, H, W), dtype=jnp.float32)
    w1 = jax.random.normal(k1, (hidden, C), dtype=jnp.float32) * 0.1   # Linear(in_ch -> hidden)
    b1 = jax.random.normal(k2, (hidden,), dtype=jnp.float32) * 0.1
    w2 = jax.random.normal(k3, (C, hidden), dtype=jnp.float32) * 0.1   # Linear(hidden -> out_ch)
    b2 = jax.random.normal(k4, (C,), dtype=jnp.float32) * 0.1

    ref = reference(x, w1, b1, w2, b2)
    # Multi-step HW grid (exercises the accumulator / pl.when path: HW=256, tile=128).
    out_tiled = jax.block_until_ready(squeeze_excite(x, w1, b1, w2, b2, tile_hw=128))
    # Default (large-tile, single HW step) configuration.
    out_default = jax.block_until_ready(squeeze_excite(x, w1, b1, w2, b2))
    assert out_tiled.shape == (B, C, H, W)
    assert out_default.shape == (B, C, H, W)
    assert jnp.allclose(out_tiled, ref, atol=1e-5, rtol=1e-5), "mismatch (tiled)"
    assert jnp.allclose(out_default, ref, atol=1e-5, rtol=1e-5), "mismatch (default)"

    # Config 2: unaligned shapes (rows=9 -> pad to 16, HW=225 -> pad to 256).
    B2, C2, H2, W2 = 3, 3, 15, 15
    hidden2 = max(1, int(C2 * 0.5))
    kx, k1, k2, k3, k4, key = jax.random.split(key, 6)
    x_u = jax.random.normal(kx, (B2, C2, H2, W2), dtype=jnp.float32)
    w1_u = jax.random.normal(k1, (hidden2, C2), dtype=jnp.float32) * 0.1
    b1_u = jax.random.normal(k2, (hidden2,), dtype=jnp.float32) * 0.1
    w2_u = jax.random.normal(k3, (C2, hidden2), dtype=jnp.float32) * 0.1
    b2_u = jax.random.normal(k4, (C2,), dtype=jnp.float32) * 0.1

    ref_u = reference(x_u, w1_u, b1_u, w2_u, b2_u)
    out_u = jax.block_until_ready(squeeze_excite(x_u, w1_u, b1_u, w2_u, b2_u))
    assert out_u.shape == (B2, C2, H2, W2)
    assert jnp.allclose(out_u, ref_u, atol=1e-5, rtol=1e-5), "mismatch (unaligned)"

    print("KERNEL_OK")
</pallas_src>

<mosaic_0001>
module attributes {stable_mosaic.version = 11 : i64} {
  func.func @_pool_kernel(%arg0: i32, %arg1: i32, %arg2: memref<8x128xf32, #tpu.memory_space<vmem>>, %arg3: memref<8x1xf32, #tpu.memory_space<vmem>>, %arg4: memref<8x128xf32, #tpu.memory_space<vmem>>) attributes {dimension_semantics = [#tpu.dimension_semantics<parallel>, #tpu.dimension_semantics<arbitrary>], iteration_bounds = array<i64: 1, 2>, scalar_prefetch = 0 : i64, scratch_operands = 1 : i64, tpu.core_type = #tpu.core_type<tc>, window_params = [{transform_indices = @transform_0, window_bounds = array<i64: 8, 128>}, {transform_indices = @transform_1, window_bounds = array<i64: 8, 1>}]} {
    %c0_i32 = arith.constant 0 : i32
    %0 = arith.cmpi eq, %arg1, %c0_i32 : i32
    %1 = arith.extui %0 : i1 to i32
    %c0_i32_0 = arith.constant 0 : i32
    %2 = arith.cmpi ne, %1, %c0_i32_0 : i32
    scf.if %2 {
      %cst = arith.constant 0.000000e+00 : f32
      %10 = vector.broadcast %cst : f32 to vector<8x128xf32>
      %c0_7 = arith.constant 0 : index
      %c0_8 = arith.constant 0 : index
      %11 = vector.load %arg4[%c0_7, %c0_8] : memref<8x128xf32, #tpu.memory_space<vmem>>, vector<8x128xf32>
      tpu.vector_store %arg4[%c0_7, %c0_8], %10 {strides = array<i32>} : memref<8x128xf32, #tpu.memory_space<vmem>>, vector<8x128xf32>,
    } else {
    }
    %c0 = arith.constant 0 : index
    %c0_1 = arith.constant 0 : index
    %3 = vector.load %arg4[%c0, %c0_1] : memref<8x128xf32, #tpu.memory_space<vmem>>, vector<8x128xf32>
    %c0_2 = arith.constant 0 : index
    %c0_3 = arith.constant 0 : index
    %4 = vector.load %arg2[%c0_2, %c0_3] : memref<8x128xf32, #tpu.memory_space<vmem>>, vector<8x128xf32>
    %5 = arith.addf %3, %4 : vector<8x128xf32>
    %c0_4 = arith.constant 0 : index
    %c0_5 = arith.constant 0 : index
    %6 = vector.load %arg4[%c0_4, %c0_5] : memref<8x128xf32, #tpu.memory_space<vmem>>, vector<8x128xf32>
    tpu.vector_store %arg4[%c0_4, %c0_5], %5 {strides = array<i32>} : memref<8x128xf32, #tpu.memory_space<vmem>>, vector<8x128xf32>,
    %c1_i32 = arith.constant 1 : i32
    %7 = arith.cmpi eq, %arg1, %c1_i32 : i32
    %8 = arith.extui %7 : i1 to i32
    %c0_i32_6 = arith.constant 0 : i32
    %9 = arith.cmpi ne, %8, %c0_i32_6 : i32
    scf.if %9 {
      %c0_7 = arith.constant 0 : index
      %c0_8 = arith.constant 0 : index
      %10 = vector.load %arg4[%c0_7, %c0_8] : memref<8x128xf32, #tpu.memory_space<vmem>>, vector<8x128xf32>
      %cst = arith.constant dense<0.000000e+00> : vector<8xf32>
      %11 = vector.multi_reduction <add>, %10, %cst [1] : vector<8x128xf32> to vector<8xf32>
      %12 = vector.shape_cast %11 : vector<8xf32> to vector<8x1xf32>
      %c0_9 = arith.constant 0 : index
      %c0_10 = arith.constant 0 : index
      %13 = vector.load %arg3[%c0_9, %c0_10] : memref<8x1xf32, #tpu.memory_space<vmem>>, vector<8x1xf32>
      tpu.vector_store %arg3[%c0_9, %c0_10], %12 {strides = array<i32>} : memref<8x1xf32, #tpu.memory_space<vmem>>, vector<8x1xf32>,
    } else {
    }
    return
  }
  func.func @transform_0(%arg0: i32, %arg1: i32) -> (i32, i32) {
    %c0_i32 = arith.constant 0 : i32
    return %arg0, %arg1 : i32, i32
  }
  func.func @transform_1(%arg0: i32, %arg1: i32) -> (i32, i32) {
    %c0_i32 = arith.constant 0 : i32
    %c0_i32_0 = arith.constant 0 : i32
    return %arg0, %c0_i32 : i32, i32
  }
}

</mosaic_0001>

<bundles_post_ra>
// kernel: tpu_custom_call.1
= control target key start
LH: loop header
LB: loop body
LE: loop exit
PB: predicated region body
PF: predicated region fallthrough
CT: control target
= control target key end

     0   :  { %6 = vsyncpa [#allocation4], 0  ;;  %s525_s0 = inlined_call_operand.hbm [shape: f32[8,256], index: 0, kind: input, shape index: {}]   ;;  %s526_s1 = inlined_call_operand.vmem [shape: f32[8,1], index: 1, kind: output, shape index: {}]  }
   0x1   :  { %8 = vsyncpa [#allocation4 + $0x1], 0  ;;  %s400_s6 = smov 0   ;;  %s402_s7 = smov 0  }
   0x2   :  { %s404_s8 = smov 0   ;;  %s406_s9 = smov 0  }
   0x3   :  { %s408_s10 = smov 0   ;;  %s410_s11 = smov 0  }
   0x4 LB: > { %s238_s12 = sadd.s32 4294967295, %s386_s11   ;;  %s23_s13 = sadd.s32 1, %s382_s10  ;;  %s386_s11 = sphi %s410_s11, %s14_s11   ;;  %s382_s10 = sphi %s408_s10, %s536_s10   ;;  %s378_s9 = sphi %s406_s9, %s535_s9   ;;  %s374_s8 = sphi %s404_s8, %s534_s8   ;;  %s370_s7 = sphi %s402_s7, %s533_s7   ;;  %s366_s6 = sphi %s400_s6, %s532_s6  }
   0x5   : > { %p24_p0 = scmp.ge.s32.totalorder %s23_s13, 2  ;;  %s35_s14 = sadd.s32 1, %s374_s8 }
   0x6   : > { %p42_p1 = scmp.ne.s32.totalorder %s374_s8, %s370_s7  ;;  %p43_p2 = scmp.eq.s32.totalorder %s386_s11, 0 }
   0x7   : > { %s538_s13 = smov (%p24_p0, %s23_s13), 0  ;;  %p48_p4 = scmp.ne.s32.totalorder %s370_s7, %s366_s6 }
   0x8   : > { %p436_p3 = por %p43_p2, %p42_p1  ;;  %s31_s16 = ssub.s32 %s382_s10, %s538_s13 }
   0x9   : > { %p49_p5 = scmp.eq.s32.totalorder %s238_s12, 0  ;;  %p33_p6 = scmp.eq.s32.totalorder %s31_s16, 0 }
   0xa   : > { %p256_p8 = scmp.lt.s32.totalorder %s386_s11, 2  ;;  %s98_s19 = sand.u32 1, %s374_s8  }
   0xb   : > { %p443_p7 = por %p49_p5, %p48_p4  ;;  %s242_s20 = sshll.u32 %s382_s10, 7 }
   0xc   : > { %s449_s18 = scalar_select %p33_p6, %s374_s8, %s35_s14  }
   0xd   : > { %s241_s21 = sshll.u32 %s98_s19, 3  ;;  %s456_s24 = scalar_lea.hbm %s525_s0, %s242_s20 }
   0xe   : > { %s102_s25 = scalar_lea.vmem [#allocation3], %s241_s21  ;;  %p460_p9 = pnand %p256_p8, %p436_p3 }
   0xf   : > { %s111_s26 = sshll.u32 %s102_s25, 4  ;;  %s99_s28 = scalar_lea.sflag [#allocation4], %s98_s19  ;;  %s464_s26 = int_to_ptr.vmem [resolvable:$true] %s111_s26 }
  0x10   : > { %s306_s29 = scalar_lea.hbm %s456_s24, 128  ;;  %p308_p13 = pneg %p460_p9 }
  0x11   : > { %p307_p12 = scmp.ne.s32.totalorder %s456_s24, %s306_s29  ;;  %s311_s3 = scalar_lea.hbm %s525_s0, 256 }
  0x12   : > { %p312_p2 = scmp.lt.u32.totalorder %s456_s24, %s525_s0  ;;  %p313_p3 = scmp.lt.u32.totalorder %s311_s3, %s306_s29 }
  0x13   : > { %p309_p0 = pnand %p308_p13, %p307_p12  ;;  %p315_p5 = scmp.lt.u32.totalorder %s306_s29, %s456_s24 }
  0x14   : > { %p314_p4 = por %p313_p3, %p312_p2 }
  0x15   : > { %p310_p1 = pneg %p309_p0 }
  0x16   : > { %p316_p6 = por %p315_p5, %p314_p4 }
  0x18   : > { %p317_p8 = pnand %p316_p6, %p310_p1 }
  0x1a   : > { %320 = shalt.err (!%p317_p8)
}
  0x1b   : > { %s321_s6 = scalar_lea.vmem %s464_s26, 128  ;;  %s388_s12 = smov [#allocation3]  }
  0x1c   : > { %p322_p12 = scmp.ne.s32.totalorder %s464_s26, %s321_s6  ;;  %s326_s14 = sshll.u32 %s388_s12, 4  ;;  %s327_s14 = int_to_ptr.vmem [resolvable:$false] %s326_s14 }
  0x1d   : > { %s328_s15 = scalar_lea.vmem %s327_s14, 256  ;;  %p329_p11 = scmp.lt.s32.totalorder %s464_s26, %s327_s14 }
  0x1e   : > { %p324_p0 = pnand %p322_p12, %p308_p13  ;;  %p330_p2 = scmp.lt.s32.totalorder %s328_s15, %s321_s6 }
  0x20   : > { %p325_p10 = pneg %p324_p0  ;;  %p331_p3 = por %p330_p2, %p329_p11 }
  0x22   : > { %p332_p4 = pnand %p331_p3, %p325_p10 }
  0x24   : > { %335 = shalt.err (!%p332_p4)
}
  0x25   : > { %255 = dma.hbm_to_vmem [thread:$0]  (!%p460_p9), %s456_s24, 128, %s464_s26, %s99_s28  }
  0x26   : > { %p530_p1 = scmp.lt.s32.totalorder %s386_s11, 3  ;;  %p531_p5 = scmp.ge.s32.totalorder %s386_s11, 1 }
  0x28   : > { %p117_p13 = pnand %p531_p5, %p530_p1 }
  0x29   : > { %s122_s16 = sand.u32 (!%p117_p13), 1, %s370_s7  }
  0x2a   : > { %120 = sbr.rel (%p117_p13) target bundleno = 213 (0xd5), region = 24  ;;  %s244_s19 = sshll.u32 (!%p117_p13), %s122_s16, 3 }
  0x2b   : > { %s123_s20 = scalar_lea.sflag (!%p117_p13), [#allocation4], %s122_s16  ;;  %s126_s21 = scalar_lea.vmem (!%p117_p13), [#allocation3], %s244_s19 }
  0x31   : > { %361 = dma.done.wait (%p443_p7), %s123_s20, 128  }
  0x32   : > { %363 = vsyncadd (%p443_p7), %s123_s20, 4294967168  ;;  %p245_p10 = scmp.ne.s32.totalorder %s378_s9, 0 }
  0x33   : > { %v389_v0 = vmov (!%p245_p10), 0.0  }
  0x34   : > { %151 = sbr.rel (%p245_p10) target bundleno = 59 (0x3b), region = 32  ;;  %152 = vst [vmem:[#allocation2] sm:$0xff] (!%p245_p10), %v389_v0 }
  0x3b PF: > { %v153_v1 = vld [vmem:[#allocation2] sm:$0xff]  ;;  %v154_v2 = vld [vmem:[%s126_s21] sm:$0xff]  ;;  %p246_p9 = scmp.ne.s32.totalorder %s378_s9, 1 }
  0x3c   : > { %v155_v3 = vadd.f32 %v154_v2, %v153_v1  ;;  %vm164_vm0 = vcmask (!%p246_p9), 7168  }
  0x3d   : > { %160 = sbr.rel (%p246_p9) target bundleno = 213 (0xd5), region = 36 }
  0x3e   : > { %156 = vst [vmem:[#allocation2] sm:$0xff] %v155_v3 }
  0x45   : > { %v161_v4 = vld [vmem:[#allocation2] sm:$0xff] }
  0x46   : > { %162 = vadd.xlane.f32.xlu0 %v161_v4 }
  0xd3   : > { %v163_v5 = vpop.xlane.xlu0 %162 }
  0xd4   : > { %165 = vst.msk [vmem:[%s526_s1] sm:$0xff] %vm164_vm0, %v163_v5 }
  0xd5 PF: > { %s14_s11 = sadd.s32 1, %s386_s11   ;;  %s532_s6 = smov %s370_s7 }
  0xd6   : > { %p11_p7 = scmp.ge.s32.totalorder %s14_s11, 4   ;;  %s533_s7 = smov %s374_s8 }
  0xd7   : > { %s534_s8 = smov %s449_s18  ;;  %s535_s9 = smov %s382_s10 }
  0xd8   : > { %s536_s10 = smov %s538_s13  ;;  %13 = sbr.rel (!%p11_p7) target bundleno = 4 (0x4), region = 72 }
  0xdf   :  { %185 = vsyncpa [#allocation4], 1 }
  0xe0   :  { %187 = vsyncpa [#allocation4 + $0x1], 1 }

</bundles_post_ra>
